<compile_context>
chip_gen: v5e
topology: v5e:2x2
jax: 0.10.0
libtpu: 0.0.40
codegen_flags: <defaults>
</compile_context>

<pallas_src>
import functools

import jax
import jax.numpy as jnp
from jax import lax
from jax.experimental import pallas as pl
from jax.experimental.pallas import tpu as pltpu


def _qkv_proj_kernel(x_ref, w_ref, q_ref, k_ref, v_ref, *, head_size):
    """Fused Q/K/V projection for one (tile, C) slab of x.

    w_ref is (C, 3H) = [W_q * H**-0.5 | W_k | W_v]; q is emitted pre-scaled.
    """
    qkv = jnp.dot(x_ref[...], w_ref[...], preferred_element_type=jnp.float32)
    q_ref[...] = qkv[:, :head_size].astype(q_ref.dtype)
    k_ref[...] = qkv[:, head_size:2 * head_size].astype(k_ref.dtype)
    v_ref[...] = qkv[:, 2 * head_size:].astype(v_ref.dtype)


def _flash_attn_kernel(q_ref, k_ref, v_ref, o_ref, m_sc, l_sc, acc_sc):
    """Flash-style causal attention for one (b, q-tile, kv-tile) grid step."""
    qi = pl.program_id(1)
    ki = pl.program_id(2)
    tq = q_ref.shape[0]
    tk = k_ref.shape[0]

    @pl.when(ki == 0)
    def _init():
        m_sc[...] = jnp.full_like(m_sc, -jnp.inf)
        l_sc[...] = jnp.zeros_like(l_sc)
        acc_sc[...] = jnp.zeros_like(acc_sc)

    def _attend(apply_mask):
        # s = q @ k^T without an explicit transpose: contract H of both.
        s = lax.dot_general(q_ref[...], k_ref[...], (((1,), (1,)), ((), ())),
                            preferred_element_type=jnp.float32)      # (tq, tk)
        if apply_mask:  # static Python bool: mask only traced on diagonal tile
            row = qi * tq + lax.broadcasted_iota(jnp.int32, (tq, tk), 0)
            col = ki * tk + lax.broadcasted_iota(jnp.int32, (tq, tk), 1)
            s = jnp.where(col <= row, s, -jnp.inf)

        # Online softmax update (fp32 elementwise math).
        m_prev = m_sc[...]
        m_new = jnp.maximum(m_prev, jnp.max(s, axis=-1, keepdims=True))
        alpha = jnp.exp(m_prev - m_new)                               # (tq, 1)
        p = jnp.exp(s - m_new)                                        # (tq, tk)
        l_sc[...] = alpha * l_sc[...] + jnp.sum(p, axis=-1, keepdims=True)
        acc_sc[...] = alpha * acc_sc[...] + jnp.dot(
            p.astype(v_ref.dtype), v_ref[...],
            preferred_element_type=jnp.float32)
        m_sc[...] = m_new

    # Fully visible tiles: no mask work.  Diagonal tile: masked.
    # Upper-triangle tiles (ki > qi): skipped entirely (and their kv DMA is
    # elided via the clamped index_map in the wrapper).
    @pl.when(ki < qi)
    def _off_diag():
        _attend(apply_mask=False)

    @pl.when(ki == qi)
    def _diag():
        _attend(apply_mask=True)

    @pl.when(ki == qi)
    def _finalize():
        # TODO(synk): nn.Dropout(p=0.2) on attention weights is identity in
        # eval mode; training-mode dropout (pltpu.prng_random_bits) omitted.
        inv_l = pl.reciprocal(l_sc[...], approx=False)  # once per q tile: free
        o_ref[...] = (acc_sc[...] * inv_l).astype(o_ref.dtype)


def head_forward(x, w_key, w_query, w_value):
    """Single-head causal self-attention (eval mode).

    x: (B, T, C) float32; w_*: (C, H) float32 (already transposed).
    """
    B, T, C = x.shape
    H = w_key.shape[1]

    # Pad T to a multiple of 128 (never a single giant block).  Padded key
    # columns have col > row for every valid query row, so the causal mask on
    # the diagonal tile removes them; padded query rows are sliced off below.
    T_pad = ((T + 127) // 128) * 128
    if T_pad != T:
        x = jnp.pad(x, ((0, 0), (0, T_pad - T), (0, 0)))

    # 256-wide tiles fill the v6e/v7x 256x256 MXU and cut grid-step overhead;
    # still correct (and tiny in VMEM) on v5e.  Fall back to 128 otherwise.
    tile = 256 if T_pad % 256 == 0 else 128
    n_tiles = T_pad // tile

    # bf16 MXU operands (fp32 accumulation in-kernel).  Fold the 1/sqrt(H)
    # scale into W_q and fuse all three projections into one (C, 3H) matmul.
    scale = jnp.float32(H) ** -0.5
    xb = x.astype(jnp.bfloat16)
    w_qkv = jnp.concatenate(
        [w_query.astype(jnp.float32) * scale, w_key, w_value],
        axis=1).astype(jnp.bfloat16)

    # --- Pass 1: fused Q/K/V projection (done once, outside the kv loop). ---
    proj_cost = pl.CostEstimate(
        flops=int(2 * B * T_pad * C * 3 * H),
        transcendentals=0,
        bytes_accessed=int(B * T_pad * C * 2 + C * 3 * H * 2
                           + 3 * B * T_pad * H * 2),
    )
    q, k, v = pl.pallas_call(
        functools.partial(_qkv_proj_kernel, head_size=H),
        out_shape=(jax.ShapeDtypeStruct((B, T_pad, H), jnp.bfloat16),) * 3,
        grid_spec=pltpu.PrefetchScalarGridSpec(
            num_scalar_prefetch=0,
            grid=(B, n_tiles),
            in_specs=[
                pl.BlockSpec((None, tile, C), lambda b, i: (b, i, 0)),
                pl.BlockSpec((C, 3 * H), lambda b, i: (0, 0)),
            ],
            out_specs=[pl.BlockSpec((None, tile, H), lambda b, i: (b, i, 0))] * 3,
        ),
        compiler_params=pltpu.CompilerParams(
            dimension_semantics=("parallel", "parallel")),
        cost_estimate=proj_cost,
    )(xb, w_qkv)

    # --- Pass 2: flash attention over pre-projected q/k/v tiles. ---
    nq = nk = n_tiles

    def kv_index(b, qi, ki):
        # Clamp to the diagonal so skipped upper-triangle tiles keep the same
        # block index and Pallas elides their DMA.
        return (b, jnp.minimum(ki, qi), 0)

    attn_cost = pl.CostEstimate(
        flops=int(B * 2 * T_pad * T_pad * H),            # ~causal half of 4*T*T*H
        transcendentals=int(B * T_pad * T_pad // 2),
        bytes_accessed=int(3 * B * T_pad * H * 2
                           + B * T_pad * H * x.dtype.itemsize),
    )
    out = pl.pallas_call(
        _flash_attn_kernel,
        out_shape=jax.ShapeDtypeStruct((B, T_pad, H), x.dtype),
        grid_spec=pltpu.PrefetchScalarGridSpec(
            num_scalar_prefetch=0,
            grid=(B, nq, nk),
            in_specs=[
                pl.BlockSpec((None, tile, H), lambda b, qi, ki: (b, qi, 0)),
                pl.BlockSpec((None, tile, H), kv_index),
                pl.BlockSpec((None, tile, H), kv_index),
            ],
            out_specs=pl.BlockSpec((None, tile, H), lambda b, qi, ki: (b, qi, 0)),
            scratch_shapes=[
                pltpu.VMEM((tile, 1), jnp.float32),   # m: running row max
                pltpu.VMEM((tile, 1), jnp.float32),   # l: running denominator
                pltpu.VMEM((tile, H), jnp.float32),   # acc: running output
            ],
        ),
        compiler_params=pltpu.CompilerParams(
            dimension_semantics=("parallel", "parallel", "arbitrary")),
        cost_estimate=attn_cost,
    )(q, k, v)

    return out[:, :T, :]


def head_reference(x, w_key, w_query, w_value):
    """Pure-JAX fp32 reference matching the PyTorch forward (eval mode)."""
    k = x @ w_key
    q = x @ w_query
    v = x @ w_value
    H = k.shape[-1]
    s = (q @ jnp.swapaxes(k, -2, -1)) * (H ** -0.5)
    T = x.shape[1]
    tril = jnp.tril(jnp.ones((T, T), dtype=bool))
    s = jnp.where(tril, s, -jnp.inf)
    p = jax.nn.softmax(s, axis=-1)
    return p @ v


if __name__ == "__main__":
    # GPTConfig defaults: n_embd=128, n_head=4 -> head_size=32, block_size=256.
    B, T, C = 2, 256, 128
    n_head = 4
    H = C // n_head

    key = jax.random.PRNGKey(0)
    kx, kk, kq, kv = jax.random.split(key, 4)

    x = jax.random.normal(kx, (B, T, C), dtype=jnp.float32)
    # Deterministic "nn.Linear(C, H, bias=False)" weights, stored as (C, H).
    scale = 1.0 / (C ** 0.5)
    w_key = jax.random.uniform(kk, (C, H), jnp.float32, -scale, scale)
    w_query = jax.random.uniform(kq, (C, H), jnp.float32, -scale, scale)
    w_value = jax.random.uniform(kv, (C, H), jnp.float32, -scale, scale)

    out = head_forward(x, w_key, w_query, w_value)
    out = jax.block_until_ready(out)

    ref = head_reference(x, w_key, w_query, w_value)
    assert out.shape == (B, T, H)
    # bf16 MXU operands (fp32 accumulation) => loosened tolerance vs fp32 ref.
    max_err = float(jnp.max(jnp.abs(out - ref)))
    assert jnp.allclose(out, ref, atol=2e-2, rtol=2e-2), (
        f"mismatch vs reference: max abs err {max_err:.3e}")

    print("KERNEL_OK")
</pallas_src>

<mosaic_0001>
module attributes {stable_mosaic.version = 11 : i64} {
  func.func @_qkv_proj_kernel(%arg0: i32, %arg1: i32, %arg2: memref<1x256x128xbf16, #tpu.memory_space<vmem>>, %arg3: memref<128x96xbf16, #tpu.memory_space<vmem>>, %arg4: memref<1x256x32xbf16, #tpu.memory_space<vmem>>, %arg5: memref<1x256x32xbf16, #tpu.memory_space<vmem>>, %arg6: memref<1x256x32xbf16, #tpu.memory_space<vmem>>) attributes {dimension_semantics = [#tpu.dimension_semantics<parallel>, #tpu.dimension_semantics<parallel>], iteration_bounds = array<i64: 2, 1>, scalar_prefetch = 0 : i64, scratch_operands = 0 : i64, tpu.core_type = #tpu.core_type<tc>, window_params = [{transform_indices = @transform_0, window_bounds = array<i64: 1, 256, 128>}, {pipeline_mode = #tpu.pipeline_mode<synchronous>, transform_indices = @transform_1, window_bounds = array<i64: 128, 96>}, {transform_indices = @transform_2, window_bounds = array<i64: 1, 256, 32>}, {transform_indices = @transform_3, window_bounds = array<i64: 1, 256, 32>}, {transform_indices = @transform_4, window_bounds = array<i64: 1, 256, 32>}]} {
    %c0 = arith.constant 0 : index
    %c0_0 = arith.constant 0 : index
    %c0_1 = arith.constant 0 : index
    %0 = vector.load %arg2[%c0, %c0_0, %c0_1] : memref<1x256x128xbf16, #tpu.memory_space<vmem>>, vector<1x256x128xbf16>
    %1 = vector.shape_cast %0 : vector<1x256x128xbf16> to vector<256x128xbf16>
    %c0_2 = arith.constant 0 : index
    %c0_3 = arith.constant 0 : index
    %2 = vector.load %arg3[%c0_2, %c0_3] : memref<128x96xbf16, #tpu.memory_space<vmem>>, vector<128x96xbf16>
    %cst = arith.constant dense<0.000000e+00> : vector<256x96xf32>
    %3 = tpu.matmul %1, %2, %cst {dimension_numbers = #tpu.dot_dimension_numbers<[1], [0], [0], [1], [0, 0, 1, 1], [], []>} : vector<256x128xbf16>, vector<128x96xbf16>, vector<256x96xf32> -> vector<256x96xf32>
    %4 = vector.extract_strided_slice %3 {offsets = [0, 0], sizes = [256, 32], strides = [1, 1]} : vector<256x96xf32> to vector<256x32xf32>
    %5 = arith.truncf %4 : vector<256x32xf32> to vector<256x32xbf16>
    %c0_4 = arith.constant 0 : index
    %c0_5 = arith.constant 0 : index
    %c0_6 = arith.constant 0 : index
    %6 = vector.load %arg4[%c0_4, %c0_5, %c0_6] : memref<1x256x32xbf16, #tpu.memory_space<vmem>>, vector<1x256x32xbf16>
    %7 = vector.shape_cast %6 : vector<1x256x32xbf16> to vector<256x32xbf16>
    %8 = vector.shape_cast %5 : vector<256x32xbf16> to vector<1x256x32xbf16>
    tpu.vector_store %arg4[%c0_4, %c0_5, %c0_6], %8 {strides = array<i32>} : memref<1x256x32xbf16, #tpu.memory_space<vmem>>, vector<1x256x32xbf16>,
    %9 = vector.extract_strided_slice %3 {offsets = [0, 32], sizes = [256, 32], strides = [1, 1]} : vector<256x96xf32> to vector<256x32xf32>
    %10 = arith.truncf %9 : vector<256x32xf32> to vector<256x32xbf16>
    %c0_7 = arith.constant 0 : index
    %c0_8 = arith.constant 0 : index
    %c0_9 = arith.constant 0 : index
    %11 = vector.load %arg5[%c0_7, %c0_8, %c0_9] : memref<1x256x32xbf16, #tpu.memory_space<vmem>>, vector<1x256x32xbf16>
    %12 = vector.shape_cast %11 : vector<1x256x32xbf16> to vector<256x32xbf16>
    %13 = vector.shape_cast %10 : vector<256x32xbf16> to vector<1x256x32xbf16>
    tpu.vector_store %arg5[%c0_7, %c0_8, %c0_9], %13 {strides = array<i32>} : memref<1x256x32xbf16, #tpu.memory_space<vmem>>, vector<1x256x32xbf16>,
    %14 = vector.extract_strided_slice %3 {offsets = [0, 64], sizes = [256, 32], strides = [1, 1]} : vector<256x96xf32> to vector<256x32xf32>
    %15 = arith.truncf %14 : vector<256x32xf32> to vector<256x32xbf16>
    %c0_10 = arith.constant 0 : index
    %c0_11 = arith.constant 0 : index
    %c0_12 = arith.constant 0 : index
    %16 = vector.load %arg6[%c0_10, %c0_11, %c0_12] : memref<1x256x32xbf16, #tpu.memory_space<vmem>>, vector<1x256x32xbf16>
    %17 = vector.shape_cast %16 : vector<1x256x32xbf16> to vector<256x32xbf16>
    %18 = vector.shape_cast %15 : vector<256x32xbf16> to vector<1x256x32xbf16>
    tpu.vector_store %arg6[%c0_10, %c0_11, %c0_12], %18 {strides = array<i32>} : memref<1x256x32xbf16, #tpu.memory_space<vmem>>, vector<1x256x32xbf16>,
    return
  }
  func.func @transform_0(%arg0: i32, %arg1: i32) -> (i32, i32, i32) {
    %c0_i32 = arith.constant 0 : i32
    %c0_i32_0 = arith.constant 0 : i32
    return %arg0, %arg1, %c0_i32 : i32, i32, i32
  }
  func.func @transform_1(%arg0: i32, %arg1: i32) -> (i32, i32) {
    %c0_i32 = arith.constant 0 : i32
    %c0_i32_0 = arith.constant 0 : i32
    %c0_i32_1 = arith.constant 0 : i32
    return %c0_i32, %c0_i32_0 : i32, i32
  }
  func.func @transform_2(%arg0: i32, %arg1: i32) -> (i32, i32, i32) {
    %c0_i32 = arith.constant 0 : i32
    %c0_i32_0 = arith.constant 0 : i32
    return %arg0, %arg1, %c0_i32 : i32, i32, i32
  }
  func.func @transform_3(%arg0: i32, %arg1: i32) -> (i32, i32, i32) {
    %c0_i32 = arith.constant 0 : i32
    %c0_i32_0 = arith.constant 0 : i32
    return %arg0, %arg1, %c0_i32 : i32, i32, i32
  }
  func.func @transform_4(%arg0: i32, %arg1: i32) -> (i32, i32, i32) {
    %c0_i32 = arith.constant 0 : i32
    %c0_i32_0 = arith.constant 0 : i32
    return %arg0, %arg1, %c0_i32 : i32, i32, i32
  }
}

</mosaic_0001>

<bundles_post_ra>
// kernel: tpu_custom_call.1
= control target key start
LH: loop header
LB: loop body
LE: loop exit
PB: predicated region body
PF: predicated region fallthrough
CT: control target
= control target key end

     0   :  { %10 = vsyncpa [#allocation3], 0  ;;  %s1897_s0 = inlined_call_operand.hbm [shape: bf16[2,256,128], index: 0, kind: input, shape index: {}]   ;;  %s1898_s1 = inlined_call_operand.vmem [shape: bf16[128,96], index: 1, kind: input, shape index: {}]   ;;  %s1899_s2 = inlined_call_operand.vmem [shape: bf16[2,256,32], index: 2, kind: output, shape index: {0}]   ;;  %s1900_s3 = inlined_call_operand.vmem [shape: bf16[2,256,32], index: 3, kind: output, shape index: {1}]   ;;  %s1901_s4 = inlined_call_operand.vmem [shape: bf16[2,256,32], index: 4, kind: output, shape index: {2}]  }
   0x1   :  { %12 = vsyncpa [#allocation3 + $0x1], 0  ;;  %s1459_s15 = smov 0   ;;  %s1461_s16 = smov 0  }
   0x2   :  { %s1463_s17 = smov 0   ;;  %s1465_s18 = smov 0  }
   0x3   :  { %s1467_s19 = smov 0   ;;  %s1469_s20 = smov 0  }
   0x4 LB: > { %s1124_s21 = sadd.s32 4294967295, %s1428_s20   ;;  %s30_s22 = sadd.s32 1, %s1424_s19  ;;  %s1428_s20 = sphi %s1469_s20, %s18_s20   ;;  %s1424_s19 = sphi %s1467_s19, %s1908_s19   ;;  %s1420_s18 = sphi %s1465_s18, %s1907_s18   ;;  %s1416_s17 = sphi %s1463_s17, %s1906_s17   ;;  %s1412_s16 = sphi %s1461_s16, %s1905_s16   ;;  %s1408_s15 = sphi %s1459_s15, %s1904_s15  }
   0x5   : > { %p32_p0 = scmp.ge.s32.totalorder %s30_s22, 2  ;;  %s39_s23 = sadd.s32 1, %s1416_s17 }
   0x6   : > { %p46_p1 = scmp.ne.s32.totalorder %s1416_s17, %s1412_s16  ;;  %p47_p2 = scmp.eq.s32.totalorder %s1428_s20, 0 }
   0x7   : > { %s1910_s22 = smov (%p32_p0, %s30_s22), 0  ;;  %p52_p4 = scmp.ne.s32.totalorder %s1412_s16, %s1408_s15 }
   0x8   : > { %p1495_p3 = por %p47_p2, %p46_p1  ;;  %s34_s25 = ssub.s32 %s1424_s19, %s1910_s22 }
   0x9   : > { %p53_p5 = scmp.eq.s32.totalorder %s1124_s21, 0  ;;  %p37_p6 = scmp.eq.s32.totalorder %s34_s25, 0 }
   0xa   : > { %p1295_p8 = scmp.lt.s32.totalorder %s1428_s20, 2  ;;  %s184_s28 = sand.u32 1, %s1416_s17  }
   0xb   : > { %p1502_p7 = por %p53_p5, %p52_p4  ;;  %s1237_s29 = sshll.u32 %s1424_s19, 7 }
   0xc   : > { %s1508_s27 = scalar_select %p37_p6, %s1416_s17, %s39_s23  }
   0xd   : > { %s1128_s30 = sshll.u32 %s184_s28, 7  ;;  %s195_s7 = scalar_lea.hbm %s1897_s0, %s1237_s29 }
   0xe   : > { %s196_s8 = sshll.u32 %s195_s7, 4  ;;  %s188_s9 = scalar_lea.vmem [#allocation2], %s1128_s30  ;;  %s197_s8 = int_to_ptr.hbm [resolvable:$true] %s196_s8 }
   0xf   : > { %s198_s10 = sshll.u32 %s188_s9, 4  ;;  %p1292_p9 = pnand %p1295_p8, %p1495_p3  ;;  %s199_s10 = int_to_ptr.vmem [resolvable:$true] %s198_s10 }
  0x10   : > { %p1131_p10 = scmp.ge.s32.totalorder %s1428_s20, 1  ;;  %p206_p11 = scmp.lt.s32.totalorder %s1428_s20, 3 }
  0x11   : > { %s185_s11 = scalar_lea.sflag [#allocation3], %s184_s28  ;;  %s1430_s12 = smov 64  }
  0x12   : > { %s1431_s13 = smov 4   ;;  %p207_p12 = pnand %p1131_p10, %p206_p11 }
  0x13   : > { %1294 = dma.hbm_to_vmem [thread:$0]  (!%p1292_p9), %s197_s8, 2048, %s199_s10, %s185_s11, %s1430_s12, %s1430_s12, %s1431_s13  }
  0x14   : > { %210 = sbr.rel (%p207_p12) target bundleno = 471 (0x1d7), region = 28  ;;  %s212_s14 = sand.u32 (!%p207_p12), 1, %s1412_s16  }
  0x15   : > { %s1132_s15 = sshll.u32 (!%p207_p12), %s212_s14, 7  ;;  %s213_s21 = scalar_lea.sflag (!%p207_p12), [#allocation3], %s212_s14 }
  0x16   : > { %s1520_s23 = scalar_lea.vmem (!%p207_p12), [#allocation2], %s1132_s15 }
  0x19   : > { %1403 = dma.done.wait (%p1502_p7), %s213_s21, 2048  }
  0x1a   : > { %1405 = vsyncadd (%p1502_p7), %s213_s21, 4294965248  ;;  %v1264_v0 = vld [vmem:[%s1898_s1 + $0x38] sm:$0xff]  ;;  %v1263_v1 = vld [vmem:[%s1898_s1 + $0x30] sm:$0xff]  ;;  %p266_p13 = scmp.lt.s32.totalorder %s1420_s18, 1  ;;  %vm608_vm0 = vcmask 257024  }
  0x1b   : > { %487 = vmatpush.bf16.msra.mxu0 %v1264_v0  ;;  %1265 = vmatpush.bf16.msra.mxu1 %v1264_v0  ;;  %v1262_v2 = vld [vmem:[%s1898_s1 + $0x28] sm:$0xff]  ;;  %v1261_v3 = vld [vmem:[%s1898_s1 + $0x20] sm:$0xff]  ;;  %v1260_v4 = vld [vmem:[%s1898_s1 + $0x18] sm:$0xff] }
  0x1c   : > { %1267 = vmatpush.bf16.msra.mxu3 %v1264_v0  ;;  %1266 = vmatpush.bf16.msra.mxu2 %v1264_v0  ;;  %v1259_v5 = vld [vmem:[%s1898_s1 + $0x10] sm:$0xff]  ;;  %v1258_v6 = vld [vmem:[%s1898_s1 + $0x8] sm:$0xff]  ;;  %v1257_v7 = vld [vmem:[%s1898_s1] sm:$0xff]  ;;  %s1912_s18 = smov (!%p266_p13, %s1420_s18), 1 }
  0x1d   : > { %v1241_v8 = vld [vmem:[%s1520_s23] sm:$0xff]  ;;  %v1242_v12 = vld [vmem:[%s1520_s23 + $0x8] sm:$0xff]  ;;  %v1243_v16 = vld [vmem:[%s1520_s23 + $0x10] sm:$0xff]  ;;  %s1568_s15 = sshll.u32 %s1912_s18, 7  ;;  %s1433_s18 = smov 96  }
  0x1e   : > { %v1245_v9 = vld [vmem:[%s1520_s23 + $0x20] sm:$0xff]  ;;  %v1246_v13 = vld [vmem:[%s1520_s23 + $0x28] sm:$0xff]  ;;  %v1247_v17 = vld [vmem:[%s1520_s23 + $0x30] sm:$0xff]  ;;  %s1574_s25 = scalar_lea.vmem %s1899_s2, %s1568_s15  ;;  %s1671_s30 = scalar_lea.vmem %s1900_s3, %s1568_s15 }
  0x1f   : > { %488 = vmatpush.bf16.msra.mxu0 %v1263_v1  ;;  %1268 = vmatpush.bf16.msra.mxu1 %v1263_v1  ;;  %v1253_v10 = vld [vmem:[%s1520_s23 + $0x60] sm:$0xff]  ;;  %v1254_v14 = vld [vmem:[%s1520_s23 + $0x68] sm:$0xff]  ;;  %v1255_v18 = vld [vmem:[%s1520_s23 + $0x70] sm:$0xff]  ;;  %s1691_s6 = scalar_lea.vmem %s1901_s4, %s1568_s15 }
  0x20   : > { %1270 = vmatpush.bf16.msra.mxu3 %v1263_v1  ;;  %1269 = vmatpush.bf16.msra.mxu2 %v1263_v1  ;;  %v1249_v11 = vld [vmem:[%s1520_s23 + $0x40] sm:$0xff]  ;;  %v1250_v15 = vld [vmem:[%s1520_s23 + $0x48] sm:$0xff]  ;;  %v1251_v19 = vld [vmem:[%s1520_s23 + $0x50] sm:$0xff] }
  0x21   : > { %v1244_v20 = vld [vmem:[%s1520_s23 + $0x18] sm:$0xff] }
  0x22   : > { %v1248_v21 = vld [vmem:[%s1520_s23 + $0x38] sm:$0xff] }
  0x23   : > { %489 = vmatpush.bf16.msra.mxu0 %v1262_v2  ;;  %1271 = vmatpush.bf16.msra.mxu1 %v1262_v2  ;;  %v1252_v22 = vld [vmem:[%s1520_s23 + $0x58] sm:$0xff] }
  0x24   : > { %1273 = vmatpush.bf16.msra.mxu3 %v1262_v2  ;;  %1272 = vmatpush.bf16.msra.mxu2 %v1262_v2  ;;  %v1256_v23 = vld [vmem:[%s1520_s23 + $0x78] sm:$0xff]  ;;  %s1432_s23 = smov 64  }
  0x27   : > { %490 = vmatpush.bf16.msra.mxu0 %v1261_v3  ;;  %1274 = vmatpush.bf16.msra.mxu1 %v1261_v3 }
  0x28   : > { %1276 = vmatpush.bf16.msra.mxu3 %v1261_v3  ;;  %1275 = vmatpush.bf16.msra.mxu2 %v1261_v3 }
  0x2b   : > { %491 = vmatpush.bf16.msra.mxu0 %v1260_v4  ;;  %1277 = vmatpush.bf16.msra.mxu1 %v1260_v4 }
  0x2c   : > { %1279 = vmatpush.bf16.msra.mxu3 %v1260_v4  ;;  %1278 = vmatpush.bf16.msra.mxu2 %v1260_v4 }
  0x2f   : > { %492 = vmatpush.bf16.msra.mxu0 %v1259_v5  ;;  %1280 = vmatpush.bf16.msra.mxu1 %v1259_v5 }
  0x30   : > { %1282 = vmatpush.bf16.msra.mxu3 %v1259_v5  ;;  %1281 = vmatpush.bf16.msra.mxu2 %v1259_v5 }
  0x33   : > { %493 = vmatpush.bf16.msra.mxu0 %v1258_v6  ;;  %1283 = vmatpush.bf16.msra.mxu1 %v1258_v6 }
  0x34   : > { %1285 = vmatpush.bf16.msra.mxu3 %v1258_v6  ;;  %1284 = vmatpush.bf16.msra.mxu2 %v1258_v6 }
  0x37   : > { %494 = vmatpush.bf16.msra.mxu0 %v1257_v7  ;;  %1286 = vmatpush.bf16.msra.mxu1 %v1257_v7 }
  0x38   : > { %1288 = vmatpush.bf16.msra.mxu3 %v1257_v7  ;;  %1287 = vmatpush.bf16.msra.mxu2 %v1257_v7 }
  0x3a   : > { %495 = vmatmul.bf16.vlgmr.msra.gmra.mxu0 %v1241_v8  ;;  %515 = vmatmul.bf16.vlgmr.msra.gmra.mxu1 %v1245_v9 }
  0x3b   : > { %555 = vmatmul.bf16.vlgmr.msra.gmra.mxu3 %v1253_v10  ;;  %535 = vmatmul.bf16.vlgmr.msra.gmra.mxu2 %v1249_v11 }
  0x4a   : > { %500 = vmatmul.bf16.gmra.mxu0 %v1242_v12  ;;  %520 = vmatmul.bf16.gmra.mxu1 %v1246_v13 }
  0x4b   : > { %560 = vmatmul.bf16.gmra.mxu3 %v1254_v14  ;;  %540 = vmatmul.bf16.gmra.mxu2 %v1250_v15 }
  0x5a   : > { %505 = vmatmul.bf16.gmra.mxu0 %v1243_v16  ;;  %525 = vmatmul.bf16.gmra.mxu1 %v1247_v17 }
  0x5b   : > { %565 = vmatmul.bf16.gmra.mxu3 %v1255_v18  ;;  %545 = vmatmul.bf16.gmra.mxu2 %v1251_v19 }
  0x6a   : > { %510 = vmatmul.bf16.gmra.mxu0 %v1244_v20  ;;  %530 = vmatmul.bf16.gmra.mxu1 %v1248_v21 }
  0x6b   : > { %550 = vmatmul.bf16.gmra.mxu2 %v1252_v22  ;;  %570 = vmatmul.bf16.gmra.mxu3 %v1256_v23 }
  0xb7   : > { %v496_v24 = vpop.f32.mrf.mxu0  ;;  %v516_v25 = vpop.f32.mrf.mxu1 }
  0xb8   : > { %v576_v26 = vpack.c.bf16 %v496_v24, %v496_v24  ;;  %v584_v27 = vpack.c.bf16 %v516_v25, %v516_v25 }
  0xba   : > { %609 = vst.msk [vmem:[%s1574_s25] sm:$0xf] %vm608_vm0, %v576_v26  ;;  %817 = vrot.lane.b32.xlu1 %v584_v27, %s1432_s23  ;;  %689 = vrot.lane.b32.xlu2 %v584_v27, %s1433_s18 }
  0xbb   : > { %617 = vst.msk [vmem:[%s1574_s25 + $0x20] sm:$0xf] %vm608_vm0, %v584_v27  ;;  %673 = vrot.lane.b32.xlu0 %v576_v26, %s1433_s18 }
  0xbe   : > { %v556_v28 = vpop.f32.mrf.mxu3  ;;  %v536_v29 = vpop.f32.mrf.mxu2 }
  0xbf   : > { %v600_v30 = vpack.c.bf16 %v556_v28, %v556_v28  ;;  %v498_v31 = vpop.f32.mrf.mxu0  ;;  %v518_v32 = vpop.f32.mrf.mxu1  ;;  %v592_v33 = vpack.c.bf16 %v536_v29, %v536_v29 }
  0xc0   : > { %v577_v34 = vpack.c.bf16 %v498_v31, %v498_v31  ;;  %v585_v35 = vpack.c.bf16 %v518_v32, %v518_v32 }
  0xc1   : > { %633 = vst.msk [vmem:[%s1574_s25 + $0x60] sm:$0xf] %vm608_vm0, %v600_v30 }
  0xc2   : > { %610 = vst.msk [vmem:[%s1574_s25 + $0x4] sm:$0xf] %vm608_vm0, %v577_v34  ;;  %705 = vrot.lane.b32.xlu1 %v592_v33, %s1433_s18  ;;  %801 = vrot.lane.b32.xlu2 %v576_v26, %s1432_s23 }
  0xc3   : > { %618 = vst.msk [vmem:[%s1574_s25 + $0x24] sm:$0xf] %vm608_vm0, %v585_v35  ;;  %721 = vrot.lane.b32.xlu0 %v600_v30, %s1433_s18 }
  0xc4   : > { %625 = vst.msk [vmem:[%s1574_s25 + $0x40] sm:$0xf] %vm608_vm0, %v592_v33 }
  0xc6   : > { %v558_v36 = vpop.f32.mrf.mxu3  ;;  %v538_v37 = vpop.f32.mrf.mxu2 }
  0xc7   : > { %v601_v38 = vpack.c.bf16 %v558_v36, %v558_v36  ;;  %v593_v39 = vpack.c.bf16 %v538_v37, %v538_v37  ;;  %v501_v40 = vpop.f32.mrf.mxu0  ;;  %v521_v41 = vpop.f32.mrf.mxu1 }
  0xc8   : > { %v578_v42 = vpack.c.bf16 %v501_v40, %v501_v40  ;;  %v586_v43 = vpack.c.bf16 %v521_v41, %v521_v41 }
  0xc9   : > { %634 = vst.msk [vmem:[%s1574_s25 + $0x64] sm:$0xf] %vm608_vm0, %v601_v38 }
  0xca   : > { %626 = vst.msk [vmem:[%s1574_s25 + $0x44] sm:$0xf] %vm608_vm0, %v593_v39  ;;  %723 = vrot.lane.b32.xlu1 %v601_v38, %s1433_s18  ;;  %849 = vrot.lane.b32.xlu2 %v600_v30, %s1432_s23 }
  0xcb   : > { %833 = vrot.lane.b32.xlu0 %v592_v33, %s1432_s23  ;;  %611 = vst.msk [vmem:[%s1574_s25 + $0x8] sm:$0xf] %vm608_vm0, %v578_v42 }
  0xcc   : > { %619 = vst.msk [vmem:[%s1574_s25 + $0x28] sm:$0xf] %vm608_vm0, %v586_v43 }
  0xce   : > { %v561_v44 = vpop.f32.mrf.mxu3  ;;  %v541_v45 = vpop.f32.mrf.mxu2 }
  0xcf   : > { %v503_v46 = vpop.f32.mrf.mxu0  ;;  %v602_v47 = vpack.c.bf16 %v561_v44, %v561_v44  ;;  %v523_v48 = vpop.f32.mrf.mxu1  ;;  %v594_v51 = vpack.c.bf16 %v541_v45, %v541_v45 }
  0xd0   : > { %v579_v49 = vpack.c.bf16 %v503_v46, %v503_v46  ;;  %v587_v50 = vpack.c.bf16 %v523_v48, %v523_v48 }
  0xd1   : > { %635 = vst.msk [vmem:[%s1574_s25 + $0x68] sm:$0xf] %vm608_vm0, %v602_v47 }
  0xd2   : > { %835 = vrot.lane.b32.xlu1 %v593_v39, %s1432_s23  ;;  %819 = vrot.lane.b32.xlu2 %v585_v35, %s1432_s23  ;;  %612 = vst.msk [vmem:[%s1574_s25 + $0xc] sm:$0xf] %vm608_vm0, %v579_v49 }
  0xd3   : > { %675 = vrot.lane.b32.xlu0 %v577_v34, %s1433_s18  ;;  %620 = vst.msk [vmem:[%s1574_s25 + $0x2c] sm:$0xf] %vm608_vm0, %v587_v50 }
  0xd4   : > { %627 = vst.msk [vmem:[%s1574_s25 + $0x48] sm:$0xf] %vm608_vm0, %v594_v51 }
  0xd6   : > { %v543_v52 = vpop.f32.mrf.mxu2  ;;  %v563_v53 = vpop.f32.mrf.mxu3 }
  0xd7   : > { %v595_v54 = vpack.c.bf16 %v543_v52, %v543_v52  ;;  %v603_v55 = vpack.c.bf16 %v563_v53, %v563_v53  ;;  %v506_v56 = vpop.f32.mrf.mxu0  ;;  %v526_v57 = vpop.f32.mrf.mxu1 }
  0xd8   : > { %v580_v58 = vpack.c.bf16 %v506_v56, %v506_v56  ;;  %v588_v59 = vpack.c.bf16 %v526_v57, %v526_v57 }
  0xd9   : > { %628 = vst.msk [vmem:[%s1574_s25 + $0x4c] sm:$0xf] %vm608_vm0, %v595_v54 }
  0xda   : > { %707 = vrot.lane.b32.xlu2 %v593_v39, %s1433_s18  ;;  %677 = vrot.lane.b32.xlu1 %v578_v42, %s1433_s18  ;;  %636 = vst.msk [vmem:[%s1574_s25 + $0x6c] sm:$0xf] %vm608_vm0, %v603_v55 }
  0xdb   : > { %691 = vrot.lane.b32.xlu0 %v585_v35, %s1433_s18  ;;  %613 = vst.msk [vmem:[%s1574_s25 + $0x10] sm:$0xf] %vm608_vm0, %v580_v58 }
  0xdc   : > { %621 = vst.msk [vmem:[%s1574_s25 + $0x30] sm:$0xf] %vm608_vm0, %v588_v59 }
  0xde   : > { %v566_v61 = vpop.f32.mrf.mxu3  ;;  %v546_v1 = vpop.f32.mrf.mxu2 }
  0xdf   : > { %v528_v60 = vpop.f32.mrf.mxu1  ;;  %v604_v63 = vpack.c.bf16 %v566_v61, %v566_v61  ;;  %v508_v0 = vpop.f32.mrf.mxu0  ;;  %v596_v4 = vpack.c.bf16 %v546_v1, %v546_v1 }
  0xe0   : > { %v1633_v62 = vpack.c.bf16 %v528_v60, %v528_v60  ;;  %v581_v2 = vpack.c.bf16 %v508_v0, %v508_v0 }
  0xe1   : > { %637 = vst.msk [vmem:[%s1574_s25 + $0x70] sm:$0xf] %vm608_vm0, %v604_v63 }
  0xe2   : > { %725 = vrot.lane.b32.xlu2 %v602_v47, %s1433_s18  ;;  %693 = vrot.lane.b32.xlu1 %v586_v43, %s1433_s18  ;;  %622 = vst.msk [vmem:[%s1574_s25 + $0x34] sm:$0xf] %vm608_vm0, %v1633_v62 }
  0xe3   : > { %803 = vrot.lane.b32.xlu0 %v577_v34, %s1432_s23  ;;  %614 = vst.msk [vmem:[%s1574_s25 + $0x14] sm:$0xf] %vm608_vm0, %v581_v2 }
  0xe4   : > { %629 = vst.msk [vmem:[%s1574_s25 + $0x50] sm:$0xf] %vm608_vm0, %v596_v4 }
  0xe6   : > { %v568_v3 = vpop.f32.mrf.mxu3  ;;  %v548_v6 = vpop.f32.mrf.mxu2 }
  0xe7   : > { %v1643_v5 = vpack.c.bf16 %v568_v3, %v568_v3  ;;  %v597_v7 = vpack.c.bf16 %v548_v6, %v548_v6  ;;  %v511_v8 = vpop.f32.mrf.mxu0  ;;  %v531_v9 = vpop.f32.mrf.mxu1 }
  0xe8   : > { %v1663_v10 = vpack.c.bf16 %v511_v8, %v511_v8  ;;  %v590_v11 = vpack.c.bf16 %v531_v9, %v531_v9 }
  0xe9   : > { %638 = vst.msk [vmem:[%s1574_s25 + $0x74] sm:$0xf] %vm608_vm0, %v1643_v5 }
  0xea   : > { %837 = vrot.lane.b32.xlu2 %v594_v51, %s1432_s23  ;;  %805 = vrot.lane.b32.xlu1 %v578_v42, %s1432_s23  ;;  %630 = vst.msk [vmem:[%s1574_s25 + $0x54] sm:$0xf] %vm608_vm0, %v597_v7 }
  0xeb   : > { %851 = vrot.lane.b32.xlu0 %v601_v38, %s1432_s23  ;;  %615 = vst.msk [vmem:[%s1574_s25 + $0x18] sm:$0xf] %vm608_vm0, %v1663_v10 }
  0xec   : > { %623 = vst.msk [vmem:[%s1574_s25 + $0x38] sm:$0xf] %vm608_vm0, %v590_v11 }
  0xee   : > { %v551_v17 = vpop.f32.mrf.mxu2  ;;  %v571_v18 = vpop.f32.mrf.mxu3 }
  0xef   : > { %v513_v13 = vpop.f32.mrf.mxu0  ;;  %v533_v14 = vpop.f32.mrf.mxu1  ;;  %v598_v19 = vpack.c.bf16 %v551_v17, %v551_v17  ;;  %v1696_v20 = vpack.c.bf16 %v571_v18, %v571_v18 }
  0xf0   : > { %v1681_v15 = vpack.c.bf16 %v513_v13, %v513_v13  ;;  %v1683_v16 = vpack.c.bf16 %v533_v14, %v533_v14 }
  0xf1   : > { %631 = vst.msk [vmem:[%s1574_s25 + $0x58] sm:$0xf] %vm608_vm0, %v598_v19 }
  0xf2   : > { %695 = vrot.lane.b32.xlu2 %v587_v50, %s1433_s18  ;;  %853 = vrot.lane.b32.xlu1 %v602_v47, %s1432_s23  ;;  %616 = vst.msk [vmem:[%s1574_s25 + $0x1c] sm:$0xf] %vm608_vm0, %v1681_v15 }
  0xf3   : > { %821 = vrot.lane.b32.xlu0 %v586_v43, %s1432_s23  ;;  %624 = vst.msk [vmem:[%s1574_s25 + $0x3c] sm:$0xf] %vm608_vm0, %v1683_v16 }
  0xf4   : > { %639 = vst.msk [vmem:[%s1574_s25 + $0x78] sm:$0xf] %vm608_vm0, %v1696_v20 }
  0xf6   : > { %v553_v22 = vpop.f32.mrf.mxu2  ;;  %v573_v23 = vpop.f32.mrf.mxu3 }
  0xf7   : > { %v599_v24 = vpack.c.bf16 %v553_v22, %v553_v22  ;;  %v1709_v25 = vpack.c.bf16 %v573_v23, %v573_v23 }
  0xf9   : > { %632 = vst.msk [vmem:[%s1574_s25 + $0x5c] sm:$0xf] %vm608_vm0, %v599_v24 }
  0xfa   : > { %807 = vrot.lane.b32.xlu2 %v579_v49, %s1432_s23  ;;  %679 = vrot.lane.b32.xlu1 %v579_v49, %s1433_s18  ;;  %640 = vst.msk [vmem:[%s1574_s25 + $0x7c] sm:$0xf] %vm608_vm0, %v1709_v25 }
  0xfb   : > { %709 = vrot.lane.b32.xlu0 %v594_v51, %s1433_s18 }
 0x102   : > { %855 = vrot.lane.b32.xlu2 %v603_v55, %s1432_s23  ;;  %823 = vrot.lane.b32.xlu1 %v587_v50, %s1432_s23 }
 0x103   : > { %727 = vrot.lane.b32.xlu0 %v603_v55, %s1433_s18 }
 0x10a   : > { %711 = vrot.lane.b32.xlu1 %v595_v54, %s1433_s18  ;;  %681 = vrot.lane.b32.xlu2 %v580_v58, %s1433_s18 }
 0x10b   : > { %839 = vrot.lane.b32.xlu0 %v595_v54, %s1432_s23 }
 0x112   : > { %729 = vrot.lane.b32.xlu1 %v604_v63, %s1433_s18  ;;  %825 = vrot.lane.b32.xlu2 %v588_v59, %s1432_s23 }
 0x113   : > { %697 = vrot.lane.b32.xlu0 %v588_v59, %s1433_s18 }
 0x114   : > { %v690_v12 = vpop.permute.xlu2 %689 }
 0x115   : > { %777 = vst.msk [vmem:[%s1671_s30 + $0x20] sm:$0xf] %vm608_vm0, %v690_v12 }
 0x11a   : > { %841 = vrot.lane.b32.xlu1 %v596_v4, %s1432_s23  ;;  %713 = vrot.lane.b32.xlu2 %v596_v4, %s1433_s18 }
 0x11b   : > { %809 = vrot.lane.b32.xlu0 %v580_v58, %s1432_s23 }
 0x11c   : > { %v802_v21 = vpop.permute.xlu2 %801 }
 0x11d   : > { %897 = vst.msk [vmem:[%s1691_s6] sm:$0xf] %vm608_vm0, %v802_v21 }
 0x122   : > { %699 = vrot.lane.b32.xlu1 %v1633_v62, %s1433_s18  ;;  %683 = vrot.lane.b32.xlu2 %v581_v2, %s1433_s18 }
 0x123   : > { %857 = vrot.lane.b32.xlu0 %v604_v63, %s1432_s23 }
 0x124   : > { %v850_v26 = vpop.permute.xlu2 %849 }
 0x125   : > { %921 = vst.msk [vmem:[%s1691_s6 + $0x60] sm:$0xf] %vm608_vm0, %v850_v26 }
 0x12a   : > { %811 = vrot.lane.b32.xlu1 %v581_v2, %s1432_s23  ;;  %731 = vrot.lane.b32.xlu2 %v1643_v5, %s1433_s18 }
 0x12b   : > { %827 = vrot.lane.b32.xlu0 %v1633_v62, %s1432_s23 }
 0x12c   : > { %v818_v27 = vpop.permute.xlu1 %817  ;;  %v820_v28 = vpop.permute.xlu2 %819 }
 0x12d   : > { %905 = vst.msk [vmem:[%s1691_s6 + $0x20] sm:$0xf] %vm608_vm0, %v818_v27  ;;  %v674_v29 = vpop.permute.xlu0 %673 }
 0x12e   : > { %906 = vst.msk [vmem:[%s1691_s6 + $0x24] sm:$0xf] %vm608_vm0, %v820_v28 }
 0x12f   : > { %769 = vst.msk [vmem:[%s1671_s30] sm:$0xf] %vm608_vm0, %v674_v29 }
 0x132   : > { %829 = vrot.lane.b32.xlu1 %v590_v11, %s1432_s23  ;;  %843 = vrot.lane.b32.xlu2 %v597_v7, %s1432_s23 }
 0x133   : > { %715 = vrot.lane.b32.xlu0 %v597_v7, %s1433_s18 }
 0x134   : > { %v706_v30 = vpop.permute.xlu1 %705  ;;  %v708_v31 = vpop.permute.xlu2 %707 }
 0x135   : > { %785 = vst.msk [vmem:[%s1671_s30 + $0x40] sm:$0xf] %vm608_vm0, %v706_v30  ;;  %v722_v32 = vpop.permute.xlu0 %721 }
 0x136   : > { %786 = vst.msk [vmem:[%s1671_s30 + $0x44] sm:$0xf] %vm608_vm0, %v708_v31 }
 0x137   : > { %793 = vst.msk [vmem:[%s1671_s30 + $0x60] sm:$0xf] %vm608_vm0, %v722_v32 }
 0x13a   : > { %717 = vrot.lane.b32.xlu1 %v598_v19, %s1433_s18  ;;  %701 = vrot.lane.b32.xlu2 %v590_v11, %s1433_s18 }
 0x13b   : > { %685 = vrot.lane.b32.xlu0 %v1663_v10, %s1433_s18 }
 0x13c   : > { %v724_v33 = vpop.permute.xlu1 %723  ;;  %v726_v34 = vpop.permute.xlu2 %725 }
 0x13d   : > { %794 = vst.msk [vmem:[%s1671_s30 + $0x64] sm:$0xf] %vm608_vm0, %v724_v33  ;;  %v834_v35 = vpop.permute.xlu0 %833 }
 0x13e   : > { %795 = vst.msk [vmem:[%s1671_s30 + $0x68] sm:$0xf] %vm608_vm0, %v726_v34 }
 0x13f   : > { %913 = vst.msk [vmem:[%s1691_s6 + $0x40] sm:$0xf] %vm608_vm0, %v834_v35 }
 0x142   : > { %813 = vrot.lane.b32.xlu2 %v1663_v10, %s1432_s23  ;;  %687 = vrot.lane.b32.xlu1 %v1681_v15, %s1433_s18 }
 0x143   : > { %733 = vrot.lane.b32.xlu0 %v1696_v20, %s1433_s18 }
 0x144   : > { %v836_v36 = vpop.permute.xlu1 %835  ;;  %v838_v37 = vpop.permute.xlu2 %837 }
 0x145   : > { %914 = vst.msk [vmem:[%s1691_s6 + $0x44] sm:$0xf] %vm608_vm0, %v836_v36  ;;  %v676_v38 = vpop.permute.xlu0 %675 }
 0x146   : > { %915 = vst.msk [vmem:[%s1691_s6 + $0x48] sm:$0xf] %vm608_vm0, %v838_v37 }
 0x147   : > { %770 = vst.msk [vmem:[%s1671_s30 + $0x4] sm:$0xf] %vm608_vm0, %v676_v38 }
 0x14a   : > { %831 = vrot.lane.b32.xlu2 %v1683_v16, %s1432_s23  ;;  %735 = vrot.lane.b32.xlu1 %v1709_v25, %s1433_s18 }
 0x14b   : > { %845 = vrot.lane.b32.xlu0 %v598_v19, %s1432_s23 }
 0x14c   : > { %v696_v39 = vpop.permute.xlu2 %695  ;;  %v678_v40 = vpop.permute.xlu1 %677 }
 0x14d   : > { %780 = vst.msk [vmem:[%s1671_s30 + $0x2c] sm:$0xf] %vm608_vm0, %v696_v39  ;;  %v692_v41 = vpop.permute.xlu0 %691 }
 0x14e   : > { %778 = vst.msk [vmem:[%s1671_s30 + $0x24] sm:$0xf] %vm608_vm0, %v692_v41 }
 0x14f   : > { %771 = vst.msk [vmem:[%s1671_s30 + $0x8] sm:$0xf] %vm608_vm0, %v678_v40 }
 0x152   : > { %719 = vrot.lane.b32.xlu2 %v599_v24, %s1433_s18  ;;  %847 = vrot.lane.b32.xlu1 %v599_v24, %s1432_s23 }
 0x153   : > { %703 = vrot.lane.b32.xlu0 %v1683_v16, %s1433_s18 }
 0x154   : > { %v694_v42 = vpop.permute.xlu1 %693  ;;  %v808_v43 = vpop.permute.xlu2 %807 }
 0x155   : > { %v804_v44 = vpop.permute.xlu0 %803  ;;  %779 = vst.msk [vmem:[%s1671_s30 + $0x28] sm:$0xf] %vm608_vm0, %v694_v42 }
 0x156   : > { %898 = vst.msk [vmem:[%s1691_s6 + $0x4] sm:$0xf] %vm608_vm0, %v804_v44 }
 0x157   : > { %900 = vst.msk [vmem:[%s1691_s6 + $0xc] sm:$0xf] %vm608_vm0, %v808_v43 }
 0x15a   : > { %861 = vrot.lane.b32.xlu2 %v1696_v20, %s1432_s23  ;;  %859 = vrot.lane.b32.xlu1 %v1643_v5, %s1432_s23 }
 0x15b   : > { %815 = vrot.lane.b32.xlu0 %v1681_v15, %s1432_s23 }
 0x15c   : > { %v806_v45 = vpop.permute.xlu1 %805  ;;  %v856_v46 = vpop.permute.xlu2 %855 }
 0x15d   : > { %v852_v47 = vpop.permute.xlu0 %851  ;;  %899 = vst.msk [vmem:[%s1691_s6 + $0x8] sm:$0xf] %vm608_vm0, %v806_v45 }
 0x15e   : > { %922 = vst.msk [vmem:[%s1691_s6 + $0x64] sm:$0xf] %vm608_vm0, %v852_v47 }
 0x15f   : > { %924 = vst.msk [vmem:[%s1691_s6 + $0x6c] sm:$0xf] %vm608_vm0, %v856_v46 }
 0x163   : > { %863 = vrot.lane.b32.xlu0 %v1709_v25, %s1432_s23 }
 0x164   : > { %v854_v48 = vpop.permute.xlu1 %853  ;;  %v682_v49 = vpop.permute.xlu2 %681 }
 0x165   : > { %v822_v50 = vpop.permute.xlu0 %821  ;;  %923 = vst.msk [vmem:[%s1691_s6 + $0x68] sm:$0xf] %vm608_vm0, %v854_v48 }
 0x166   : > { %907 = vst.msk [vmem:[%s1691_s6 + $0x28] sm:$0xf] %vm608_vm0, %v822_v50 }
 0x167   : > { %773 = vst.msk [vmem:[%s1671_s30 + $0x10] sm:$0xf] %vm608_vm0, %v682_v49 }
 0x16c   : > { %v680_v51 = vpop.permute.xlu1 %679  ;;  %v826_v52 = vpop.permute.xlu2 %825 }
 0x16d   : > { %v710_v53 = vpop.permute.xlu0 %709  ;;  %772 = vst.msk [vmem:[%s1671_s30 + $0xc] sm:$0xf] %vm608_vm0, %v680_v51 }
 0x16e   : > { %787 = vst.msk [vmem:[%s1671_s30 + $0x48] sm:$0xf] %vm608_vm0, %v710_v53 }
 0x16f   : > { %909 = vst.msk [vmem:[%s1691_s6 + $0x30] sm:$0xf] %vm608_vm0, %v826_v52 }
 0x174   : > { %v824_v54 = vpop.permute.xlu1 %823  ;;  %v714_v55 = vpop.permute.xlu2 %713 }
 0x175   : > { %v728_v56 = vpop.permute.xlu0 %727  ;;  %908 = vst.msk [vmem:[%s1691_s6 + $0x2c] sm:$0xf] %vm608_vm0, %v824_v54 }
 0x176   : > { %796 = vst.msk [vmem:[%s1671_s30 + $0x6c] sm:$0xf] %vm608_vm0, %v728_v56 }
 0x177   : > { %789 = vst.msk [vmem:[%s1671_s30 + $0x50] sm:$0xf] %vm608_vm0, %v714_v55 }
 0x17c   : > { %v712_v57 = vpop.permute.xlu1 %711  ;;  %v684_v58 = vpop.permute.xlu2 %683 }
 0x17d   : > { %v840_v59 = vpop.permute.xlu0 %839  ;;  %788 = vst.msk [vmem:[%s1671_s30 + $0x4c] sm:$0xf] %vm608_vm0, %v712_v57 }
 0x17e   : > { %916 = vst.msk [vmem:[%s1691_s6 + $0x4c] sm:$0xf] %vm608_vm0, %v840_v59 }
 0x17f   : > { %774 = vst.msk [vmem:[%s1671_s30 + $0x14] sm:$0xf] %vm608_vm0, %v684_v58 }
 0x184   : > { %v730_v60 = vpop.permute.xlu1 %729  ;;  %v732_v61 = vpop.permute.xlu2 %731 }
 0x185   : > { %v698_v62 = vpop.permute.xlu0 %697  ;;  %797 = vst.msk [vmem:[%s1671_s30 + $0x70] sm:$0xf] %vm608_vm0, %v730_v60 }
 0x186   : > { %781 = vst.msk [vmem:[%s1671_s30 + $0x30] sm:$0xf] %vm608_vm0, %v698_v62 }
 0x187   : > { %798 = vst.msk [vmem:[%s1671_s30 + $0x74] sm:$0xf] %vm608_vm0, %v732_v61 }
 0x18c   : > { %v842_v63 = vpop.permute.xlu1 %841  ;;  %v844_v0 = vpop.permute.xlu2 %843 }
 0x18d   : > { %917 = vst.msk [vmem:[%s1691_s6 + $0x50] sm:$0xf] %vm608_vm0, %v842_v63  ;;  %v810_v1 = vpop.permute.xlu0 %809 }
 0x18e   : > { %901 = vst.msk [vmem:[%s1691_s6 + $0x10] sm:$0xf] %vm608_vm0, %v810_v1 }
 0x18f   : > { %918 = vst.msk [vmem:[%s1691_s6 + $0x54] sm:$0xf] %vm608_vm0, %v844_v0 }
 0x194   : > { %v700_v2 = vpop.permute.xlu1 %699  ;;  %v702_v3 = vpop.permute.xlu2 %701 }
 0x195   : > { %782 = vst.msk [vmem:[%s1671_s30 + $0x34] sm:$0xf] %vm608_vm0, %v700_v2  ;;  %v858_v4 = vpop.permute.xlu0 %857 }
 0x196   : > { %925 = vst.msk [vmem:[%s1691_s6 + $0x70] sm:$0xf] %vm608_vm0, %v858_v4 }
 0x197   : > { %783 = vst.msk [vmem:[%s1671_s30 + $0x38] sm:$0xf] %vm608_vm0, %v702_v3 }
 0x19c   : > { %v812_v5 = vpop.permute.xlu1 %811  ;;  %v814_v6 = vpop.permute.xlu2 %813 }
 0x19d   : > { %v828_v7 = vpop.permute.xlu0 %827  ;;  %902 = vst.msk [vmem:[%s1691_s6 + $0x14] sm:$0xf] %vm608_vm0, %v812_v5 }
 0x19e   : > { %910 = vst.msk [vmem:[%s1691_s6 + $0x34] sm:$0xf] %vm608_vm0, %v828_v7 }
 0x19f   : > { %903 = vst.msk [vmem:[%s1691_s6 + $0x18] sm:$0xf] %vm608_vm0, %v814_v6 }
 0x1a4   : > { %v830_v8 = vpop.permute.xlu1 %829  ;;  %v832_v9 = vpop.permute.xlu2 %831 }
 0x1a5   : > { %v716_v10 = vpop.permute.xlu0 %715  ;;  %911 = vst.msk [vmem:[%s1691_s6 + $0x38] sm:$0xf] %vm608_vm0, %v830_v8 }
 0x1a6   : > { %790 = vst.msk [vmem:[%s1671_s30 + $0x54] sm:$0xf] %vm608_vm0, %v716_v10 }
 0x1a7   : > { %912 = vst.msk [vmem:[%s1691_s6 + $0x3c] sm:$0xf] %vm608_vm0, %v832_v9 }
 0x1ac   : > { %v718_v11 = vpop.permute.xlu1 %717  ;;  %v720_v12 = vpop.permute.xlu2 %719 }
 0x1ad   : > { %791 = vst.msk [vmem:[%s1671_s30 + $0x58] sm:$0xf] %vm608_vm0, %v718_v11  ;;  %v686_v13 = vpop.permute.xlu0 %685 }
 0x1ae   : > { %792 = vst.msk [vmem:[%s1671_s30 + $0x5c] sm:$0xf] %vm608_vm0, %v720_v12 }
 0x1af   : > { %775 = vst.msk [vmem:[%s1671_s30 + $0x18] sm:$0xf] %vm608_vm0, %v686_v13 }
 0x1b4   : > { %v862_v14 = vpop.permute.xlu2 %861  ;;  %v688_v15 = vpop.permute.xlu1 %687 }
 0x1b5   : > { %927 = vst.msk [vmem:[%s1691_s6 + $0x78] sm:$0xf] %vm608_vm0, %v862_v14  ;;  %v734_v16 = vpop.permute.xlu0 %733 }
 0x1b6   : > { %799 = vst.msk [vmem:[%s1671_s30 + $0x78] sm:$0xf] %vm608_vm0, %v734_v16 }
 0x1b7   : > { %776 = vst.msk [vmem:[%s1671_s30 + $0x1c] sm:$0xf] %vm608_vm0, %v688_v15 }
 0x1bc   : > { %v736_v17 = vpop.permute.xlu1 %735 }
 0x1bd   : > { %v846_v18 = vpop.permute.xlu0 %845  ;;  %800 = vst.msk [vmem:[%s1671_s30 + $0x7c] sm:$0xf] %vm608_vm0, %v736_v17 }
 0x1be   : > { %919 = vst.msk [vmem:[%s1691_s6 + $0x58] sm:$0xf] %vm608_vm0, %v846_v18 }
 0x1c4   : > { %v848_v19 = vpop.permute.xlu1 %847 }
 0x1c5   : > { %v704_v20 = vpop.permute.xlu0 %703  ;;  %920 = vst.msk [vmem:[%s1691_s6 + $0x5c] sm:$0xf] %vm608_vm0, %v848_v19 }
 0x1c6   : > { %784 = vst.msk [vmem:[%s1671_s30 + $0x3c] sm:$0xf] %vm608_vm0, %v704_v20 }
 0x1cc   : > { %v860_v21 = vpop.permute.xlu1 %859 }
 0x1cd   : > { %v816_v22 = vpop.permute.xlu0 %815  ;;  %926 = vst.msk [vmem:[%s1691_s6 + $0x74] sm:$0xf] %vm608_vm0, %v860_v21 }
 0x1ce   : > { %904 = vst.msk [vmem:[%s1691_s6 + $0x1c] sm:$0xf] %vm608_vm0, %v816_v22 }
 0x1d5   : > { %v864_v23 = vpop.permute.xlu0 %863 }
 0x1d6   : > { %928 = vst.msk [vmem:[%s1691_s6 + $0x7c] sm:$0xf] %vm608_vm0, %v864_v23 }
 0x1d7 PF: > { %s18_s20 = sadd.s32 1, %s1428_s20   ;;  %s1904_s15 = smov %s1412_s16 }
 0x1d8   : > { %p15_p0 = scmp.ge.s32.totalorder %s18_s20, 4   ;;  %s1905_s16 = smov %s1416_s17 }
 0x1d9   : > { %s1906_s17 = smov %s1508_s27  ;;  %s1907_s18 = smov %s1424_s19 }
 0x1da   : > { %s1908_s19 = smov %s1910_s22  ;;  %17 = sbr.rel (!%p15_p0) target bundleno = 4 (0x4), region = 92 }
 0x1df   :  { %1009 = vsyncpa [#allocation3], 1 }
 0x1e0   :  { %1011 = vsyncpa [#allocation3 + $0x1], 1 }

</bundles_post_ra>
